<compile_context>
chip_gen: v7x
topology: tpu7x:2x2x1
jax: 0.10.0
libtpu: 0.0.40
codegen_flags: <defaults>
</compile_context>

<pallas_src>
import functools
import math

import jax
import jax.numpy as jnp
import numpy as np
from jax.experimental import pallas as pl
from jax.experimental.pallas import tpu as pltpu


def _round_up(v, m):
    return ((v + m - 1) // m) * m


# ------------------------- in-kernel math helpers ---------------------------

_GELU_C = 0.7978845608028654  # sqrt(2/pi)


def _gelu_tanh(x):
    # tanh-approx GELU: the tanh goes to the (otherwise idle) EUP slot instead
    # of a long erf polynomial on the 4-wide VALU.
    return 0.5 * x * (1.0 + jnp.tanh(_GELU_C * (x + 0.044715 * x * x * x)))


def _layernorm(y, g, b, eps):
    # Two-pass statistics (mean, then variance of centered values): much less
    # cancellation-prone than E[x^2]-E[x]^2 and closer to PyTorch numerics.
    mean = jnp.mean(y, axis=-1, keepdims=True)
    c = y - mean
    var = jnp.mean(c * c, axis=-1, keepdims=True)
    return c * jax.lax.rsqrt(var + eps) * g + b


# ------------------------- tokenizer projection kernel ----------------------

def _linear_kernel(x_ref, w_ref, b_ref, o_ref):
    o_ref[...] = (jnp.dot(x_ref[...], w_ref[...],
                          preferred_element_type=jnp.float32)
                  + b_ref[...]).astype(o_ref.dtype)


def linear(x_bf16, w_bf16, b2):
    """y = x @ w + b2 with bf16 MXU operands / f32 accumulation.

    M-tiled with a parallel grid; b2 is pre-shaped (1, N) f32.
    (At production sizes make N a multiple of 128 for lane-dense stores.)
    """
    M, K = x_bf16.shape
    N = w_bf16.shape[1]
    tm = min(512, _round_up(M, 16))          # 16 = bf16 sublane packing
    Mp = _round_up(M, tm)
    if Mp != M:
        x_bf16 = jnp.pad(x_bf16, ((0, Mp - M), (0, 0)))
    out = pl.pallas_call(
        _linear_kernel,
        out_shape=jax.ShapeDtypeStruct((Mp, N), jnp.float32),
        grid=(Mp // tm,),
        in_specs=[
            pl.BlockSpec((tm, K), lambda i: (i, 0)),
            pl.BlockSpec((K, N), lambda i: (0, 0)),
            pl.BlockSpec((1, N), lambda i: (0, 0)),
        ],
        out_specs=pl.BlockSpec((tm, N), lambda i: (i, 0)),
        compiler_params=pltpu.CompilerParams(
            dimension_semantics=("parallel",)),
    )(x_bf16, w_bf16, b2)
    return out[:M]


# ------------------------- fused multi-layer BERT encoder -------------------

def _encoder_kernel(h_ref, mask_ref, qkv_w_ref, qkv_b_ref, ao_w_ref, ao_b_ref,
                    ln1_g_ref, ln1_b_ref, i_w_ref, i_b_ref, o_w_ref, o_b_ref,
                    ln2_g_ref, ln2_b_ref, o_ref, h_scr, *, num_heads, eps):
    """grid = (batch_blocks, num_layers); activations carried in VMEM scratch."""
    l = pl.program_id(1)
    Bt, S, D = h_ref.shape
    R = Bt * S
    dh = D // num_heads

    # Layer 0: pull this batch-block's tokens into the VMEM activation carry.
    @pl.when(l == 0)
    def _():
        h_scr[...] = h_ref[...].reshape(R, D)

    x = h_scr[...]                                     # (R, D) f32
    x_b = x.astype(jnp.bfloat16)

    # Fused QKV projection over the flattened rows of all Bt graphs.  The
    # 1/sqrt(dh) softmax scale is pre-folded into the Q weight columns.
    qkv = (jnp.dot(x_b, qkv_w_ref[0], preferred_element_type=jnp.float32)
           + qkv_b_ref[0])                             # (R, 3D) f32
    qkv_b16 = qkv.astype(jnp.bfloat16)
    ao_w = ao_w_ref[0]                                 # (D, D) bf16

    # Masked multi-head attention — the only per-graph part of the layer.
    attn_rows = []
    for g in range(Bt):
        qkv_g = qkv_b16[g * S:(g + 1) * S]             # sublane slice, S % 16 == 0
        # Key-padding bias, broadcast ONCE per graph (hoisted out of head loop).
        key_bias = jnp.broadcast_to((1.0 - mask_ref[g]) * (-1e9), (S, S))
        ctx_sum = None
        for hh in range(num_heads):
            # TODO(synk): per-head lane slices are not 128-aligned for dh<128;
            # at production sizes split Q/K/V at the weight-ref level or pad dh.
            q = qkv_g[:, hh * dh:(hh + 1) * dh]
            k = qkv_g[:, D + hh * dh:D + (hh + 1) * dh]
            v = qkv_g[:, 2 * D + hh * dh:2 * D + (hh + 1) * dh]
            s = jax.lax.dot_general(q, k, (((1,), (1,)), ((), ())),
                                    preferred_element_type=jnp.float32)
            s = s + key_bias
            m = jnp.max(s, axis=-1, keepdims=True)
            p = jnp.exp(s - m)
            p = p * pl.reciprocal(jnp.sum(p, axis=-1, keepdims=True),
                                  approx=True)
            ctx = jnp.dot(p.astype(jnp.bfloat16), v,
                          preferred_element_type=jnp.float32)       # (S, dh)
            # Head-by-head accumulation == concat(ctx) @ ao_w without an
            # in-kernel lane concatenate.
            piece = jnp.dot(ctx.astype(jnp.bfloat16),
                            ao_w[hh * dh:(hh + 1) * dh, :],
                            preferred_element_type=jnp.float32)     # (S, D)
            ctx_sum = piece if ctx_sum is None else ctx_sum + piece
        attn_rows.append(ctx_sum)
    attn = jnp.concatenate(attn_rows, axis=0) + ao_b_ref[0]          # (R, D)

    # Residual + LayerNorm 1 (f32 statistics).
    h1 = _layernorm(attn + x, ln1_g_ref[0], ln1_b_ref[0], eps)

    # FFN — the (R, 2D) intermediate never leaves VMEM.
    inter = (jnp.dot(h1.astype(jnp.bfloat16), i_w_ref[0],
                     preferred_element_type=jnp.float32) + i_b_ref[0])
    inter = _gelu_tanh(inter)
    ffn = (jnp.dot(inter.astype(jnp.bfloat16), o_w_ref[0],
                   preferred_element_type=jnp.float32) + o_b_ref[0])

    # Residual + LayerNorm 2, carried to the next layer in VMEM.
    h2 = _layernorm(ffn + h1, ln2_g_ref[0], ln2_b_ref[0], eps)
    h_scr[...] = h2

    # Only the last layer writes back to HBM.
    @pl.when(l == pl.num_programs(1) - 1)
    def _():
        o_ref[...] = h2.reshape(Bt, S, D).astype(o_ref.dtype)


def bert_encoder(h, mask3, stk, num_heads, *, bt_cap=8):
    """All BERT layers (eval mode, post-LN) in a single pallas_call."""
    B, S, D = h.shape
    L = stk["qkv_w"].shape[0]
    Bt = B if B <= bt_cap else bt_cap
    Bp = _round_up(B, Bt)
    if Bp != B:
        h = jnp.pad(h, ((0, Bp - B), (0, 0), (0, 0)))
        mask3 = jnp.pad(mask3, ((0, Bp - B), (0, 0), (0, 0)))

    kernel = functools.partial(_encoder_kernel, num_heads=num_heads, eps=1e-12)

    def wspec(shape):  # layer-stacked weight: block index tracks grid axis 1
        n = len(shape)
        return pl.BlockSpec((1,) + shape, lambda b, l: (l,) + (0,) * n)

    out = pl.pallas_call(
        kernel,
        out_shape=jax.ShapeDtypeStruct((Bp, S, D), jnp.float32),
        grid=(Bp // Bt, L),                            # layers innermost
        in_specs=[
            pl.BlockSpec((Bt, S, D), lambda b, l: (b, 0, 0)),   # tokens
            pl.BlockSpec((Bt, 1, S), lambda b, l: (b, 0, 0)),   # key mask
            wspec((D, 3 * D)), wspec((1, 3 * D)),               # fused QKV
            wspec((D, D)), wspec((1, D)),                       # attn out proj
            wspec((1, D)), wspec((1, D)),                       # LN1
            wspec((D, 2 * D)), wspec((1, 2 * D)),               # FFN in
            wspec((2 * D, D)), wspec((1, D)),                   # FFN out
            wspec((1, D)), wspec((1, D)),                       # LN2
        ],
        out_specs=pl.BlockSpec((Bt, S, D), lambda b, l: (b, 0, 0)),
        scratch_shapes=[pltpu.VMEM((Bt * S, D), jnp.float32)],
        compiler_params=pltpu.CompilerParams(
            # TODO(synk): use pltpu.CORE_PARALLEL on axis 0 for v7x (2 TCs).
            dimension_semantics=("parallel", "arbitrary"),
            vmem_limit_bytes=32 * 1024 * 1024),
    )(h, mask3,
      stk["qkv_w"], stk["qkv_b"], stk["ao_w"], stk["ao_b"],
      stk["ln1_g"], stk["ln1_b"], stk["i_w"], stk["i_b"],
      stk["o_w"], stk["o_b"], stk["ln2_g"], stk["ln2_b"])
    return out[:B]


# ------------------------------- parameters ---------------------------------

def init_params(key, input_feat_dim, hidden_dim, num_layers, num_heads,
                d_p, d_e):
    def xavier(k, shape):
        bound = math.sqrt(6.0 / (shape[0] + shape[1]))
        return jax.random.uniform(k, shape, jnp.float32, -bound, bound)

    keys = iter(jax.random.split(key, 8 + 8 * num_layers))
    input_dim = input_feat_dim + 2 * d_p + d_e
    D = hidden_dim
    dh = D // num_heads
    scale = 1.0 / math.sqrt(dh)

    params = {
        "E_V": xavier(next(keys), (1, d_e)),
        "E_E": xavier(next(keys), (1, d_e)),
        "edge_proj_w": xavier(next(keys), (3, input_feat_dim)),
        "edge_proj_b": jnp.zeros((1, input_feat_dim), jnp.float32),
        # matmul weights stored bf16 (half the DMA, native MXU dtype)
        "w_in_w": xavier(next(keys), (input_dim, D)).astype(jnp.bfloat16),
        "w_in_b": jnp.zeros((1, D), jnp.float32),
        "graph_token": xavier(next(keys), (1, D)),
    }

    def dense(k, din, dout):  # BERT-style init (normal, std=0.02)
        return 0.02 * jax.random.normal(k, (din, dout), jnp.float32)

    qkv_w, ao_w, i_w, o_w = [], [], [], []
    for _ in range(num_layers):
        q_w = dense(next(keys), D, D)
        k_w = dense(next(keys), D, D)
        v_w = dense(next(keys), D, D)
        # Fused QKV with the softmax 1/sqrt(dh) scale folded into Q.
        qkv_w.append(jnp.concatenate([q_w * scale, k_w, v_w], axis=1))
        ao_w.append(dense(next(keys), D, D))
        i_w.append(dense(next(keys), D, 2 * D))
        o_w.append(dense(next(keys), 2 * D, D))

    L = num_layers
    params["encoder"] = {
        # weights bf16 (MXU inputs); biases / LN params f32.
        "qkv_w": jnp.stack(qkv_w).astype(jnp.bfloat16),
        "qkv_b": jnp.zeros((L, 1, 3 * D), jnp.float32),
        "ao_w": jnp.stack(ao_w).astype(jnp.bfloat16),
        "ao_b": jnp.zeros((L, 1, D), jnp.float32),
        "ln1_g": jnp.ones((L, 1, D), jnp.float32),
        "ln1_b": jnp.zeros((L, 1, D), jnp.float32),
        "i_w": jnp.stack(i_w).astype(jnp.bfloat16),
        "i_b": jnp.zeros((L, 1, 2 * D), jnp.float32),
        "o_w": jnp.stack(o_w).astype(jnp.bfloat16),
        "o_b": jnp.zeros((L, 1, D), jnp.float32),
        "ln2_g": jnp.ones((L, 1, D), jnp.float32),
        "ln2_b": jnp.zeros((L, 1, D), jnp.float32),
    }
    return params


# --------------------------------- model -------------------------------------

def tokengt_forward(params, x, edge_index, edge_attr, batch_np,
                    d_p, d_e, hidden_dim, num_heads, id_key):
    num_nodes = x.shape[0]
    num_edges = edge_index.shape[1]
    batch_np = np.asarray(batch_np)
    ei_np = np.asarray(edge_index)
    num_graphs = int(batch_np.max()) + 1
    node_counts = np.bincount(batch_np, minlength=num_graphs)
    edge_batch = batch_np[ei_np[0]]
    edge_counts = np.bincount(edge_batch, minlength=num_graphs)
    # NOTE: edge tokens are assumed grouped by graph (edge_batch sorted), as in
    # PyG batching — same assumption as the PyTorch reference.

    # --- node identifiers (method='orf'): per-graph QR of Gaussian matrix ----
    # TODO(synk): QR / random permutation have no clean Pallas equivalent and at
    # scale should be batched or precomputed outside the forward; JAX glue here.
    P_list = []
    key = id_key
    for n in node_counts.tolist():
        key, kg, kp = jax.random.split(key, 3)
        Gm = jax.random.normal(kg, (n, n), jnp.float32)
        Q, _ = jnp.linalg.qr(Gm)
        if n < d_p:
            Q = jnp.pad(Q, ((0, 0), (0, d_p - n)))
        elif n > d_p:
            perm = jax.random.permutation(kp, n)
            Q = Q[:, perm[:d_p]]
        P_list.append(Q)
    P = jnp.concatenate(P_list, axis=0)                # (num_nodes, d_p)

    # --- tokenizer: edge_proj via XLA (tiny), shared w_in via one Pallas call -
    ea = (edge_attr.astype(jnp.float32) @ params["edge_proj_w"]
          + params["edge_proj_b"])
    E_V = jnp.broadcast_to(params["E_V"], (num_nodes, d_e))
    E_E = jnp.broadcast_to(params["E_E"], (num_edges, d_e))
    X_v = jnp.concatenate([x, P, P, E_V], axis=1)
    X_e = jnp.concatenate([ea, P[ei_np[0]], P[ei_np[1]], E_E], axis=1)
    X_all = jnp.concatenate([X_v, X_e], axis=0).astype(jnp.bfloat16)
    X_proj = linear(X_all, params["w_in_w"], params["w_in_b"])
    X_v_proj, X_e_proj = X_proj[:num_nodes], X_proj[num_nodes:]

    # --- prepare_tokens: vectorized segment-offset scatters -------------------
    max_node = int(node_counts.max())
    max_edge = int(edge_counts.max())
    seq_len = 1 + max_node + max_edge                  # use_graph_token=True
    S_pad = _round_up(seq_len, 16)                     # bf16 sublane packing

    node_ptr = np.concatenate([[0], np.cumsum(node_counts)])
    edge_ptr = np.concatenate([[0], np.cumsum(edge_counts)])
    node_slot = 1 + np.arange(num_nodes) - node_ptr[batch_np]
    edge_slot = 1 + max_node + np.arange(num_edges) - edge_ptr[edge_batch]

    tokens = jnp.zeros((num_graphs, S_pad, hidden_dim), jnp.float32)
    tokens = tokens.at[:, 0, :].set(params["graph_token"][0])
    tokens = tokens.at[jnp.asarray(batch_np), jnp.asarray(node_slot)].set(X_v_proj)
    tokens = tokens.at[jnp.asarray(edge_batch), jnp.asarray(edge_slot)].set(X_e_proj)

    masks_np = np.zeros((num_graphs, S_pad), dtype=bool)
    masks_np[:, 0] = True
    masks_np[batch_np, node_slot] = True
    masks_np[edge_batch, edge_slot] = True
    mask3 = jnp.asarray(masks_np, jnp.float32).reshape(num_graphs, 1, S_pad)

    # --- BERT encoder: ONE fused Pallas kernel for all layers -----------------
    h = bert_encoder(tokens, mask3, params["encoder"], num_heads)

    masks = jnp.asarray(masks_np[:, :seq_len])
    return h[:, :seq_len], masks


# ---------------------------------- main --------------------------------------

if __name__ == "__main__":
    key = jax.random.PRNGKey(0)
    input_feat_dim = 8
    hidden_dim = 32
    num_layers = 2
    num_heads = 2
    d_p = 4
    d_e = 4

    # 2 graphs: graph 0 has 5 nodes / 6 directed edges, graph 1 has 3 nodes / 4 edges
    batch_np = np.array([0, 0, 0, 0, 0, 1, 1, 1], dtype=np.int32)
    num_nodes = batch_np.shape[0]
    edge_index = jnp.array(
        [[0, 1, 1, 2, 3, 4, 5, 6, 6, 7],
         [1, 0, 2, 1, 4, 3, 6, 5, 7, 6]], dtype=jnp.int32)

    k1, k2, k3, k4 = jax.random.split(key, 4)
    x = jax.random.normal(k1, (num_nodes, input_feat_dim), jnp.float32)
    edge_attr = jax.random.normal(k2, (edge_index.shape[1], 3), jnp.float32)
    params = init_params(k3, input_feat_dim, hidden_dim, num_layers,
                         num_heads, d_p, d_e)

    out, masks = tokengt_forward(params, x, edge_index, edge_attr, batch_np,
                                 d_p, d_e, hidden_dim, num_heads, k4)
    jax.block_until_ready(out)
    jax.block_until_ready(masks)

    expected_seq = 1 + 5 + 6  # graph token + max_node + max_edge
    assert out.shape == (2, expected_seq, hidden_dim), out.shape
    assert masks.shape == (2, expected_seq), masks.shape
    assert bool(jnp.all(jnp.isfinite(out)))
    print("KERNEL_OK")
</pallas_src>

<mosaic_0001>
module attributes {stable_mosaic.version = 11 : i64} {
  func.func @_linear_kernel(%arg0: i32, %arg1: memref<32x20xbf16, #tpu.memory_space<vmem>>, %arg2: memref<20x32xbf16, #tpu.memory_space<vmem>>, %arg3: memref<1x32xf32, #tpu.memory_space<vmem>>, %arg4: memref<32x32xf32, #tpu.memory_space<vmem>>) attributes {dimension_semantics = [#tpu.dimension_semantics<parallel>], iteration_bounds = array<i64: 1>, scalar_prefetch = 0 : i64, scratch_operands = 0 : i64, tpu.core_type = #tpu.core_type<tc>, window_params = [{transform_indices = @transform_0, window_bounds = array<i64: 32, 20>}, {pipeline_mode = #tpu.pipeline_mode<synchronous>, transform_indices = @transform_1, window_bounds = array<i64: 20, 32>}, {pipeline_mode = #tpu.pipeline_mode<synchronous>, transform_indices = @transform_2, window_bounds = array<i64: 1, 32>}, {transform_indices = @transform_3, window_bounds = array<i64: 32, 32>}]} {
    %c0 = arith.constant 0 : index
    %c0_0 = arith.constant 0 : index
    %0 = vector.load %arg1[%c0, %c0_0] : memref<32x20xbf16, #tpu.memory_space<vmem>>, vector<32x20xbf16>
    %c0_1 = arith.constant 0 : index
    %c0_2 = arith.constant 0 : index
    %1 = vector.load %arg2[%c0_1, %c0_2] : memref<20x32xbf16, #tpu.memory_space<vmem>>, vector<20x32xbf16>
    %cst = arith.constant dense<0.000000e+00> : vector<32x32xf32>
    %2 = tpu.matmul %0, %1, %cst {dimension_numbers = #tpu.dot_dimension_numbers<[1], [0], [0], [1], [0, 0, 1, 1], [], []>} : vector<32x20xbf16>, vector<20x32xbf16>, vector<32x32xf32> -> vector<32x32xf32>
    %c0_3 = arith.constant 0 : index
    %c0_4 = arith.constant 0 : index
    %3 = vector.load %arg3[%c0_3, %c0_4] : memref<1x32xf32, #tpu.memory_space<vmem>>, vector<1x32xf32>
    %4 = vector.broadcast %3 : vector<1x32xf32> to vector<32x32xf32>
    %5 = arith.addf %2, %4 : vector<32x32xf32>
    %c0_5 = arith.constant 0 : index
    %c0_6 = arith.constant 0 : index
    %6 = vector.load %arg4[%c0_5, %c0_6] : memref<32x32xf32, #tpu.memory_space<vmem>>, vector<32x32xf32>
    tpu.vector_store %arg4[%c0_5, %c0_6], %5 {strides = array<i32>} : memref<32x32xf32, #tpu.memory_space<vmem>>, vector<32x32xf32>,
    return
  }
  func.func @transform_0(%arg0: i32) -> (i32, i32) {
    %c0_i32 = arith.constant 0 : i32
    %c0_i32_0 = arith.constant 0 : i32
    return %arg0, %c0_i32 : i32, i32
  }
  func.func @transform_1(%arg0: i32) -> (i32, i32) {
    %c0_i32 = arith.constant 0 : i32
    %c0_i32_0 = arith.constant 0 : i32
    %c0_i32_1 = arith.constant 0 : i32
    return %c0_i32, %c0_i32_0 : i32, i32
  }
  func.func @transform_2(%arg0: i32) -> (i32, i32) {
    %c0_i32 = arith.constant 0 : i32
    %c0_i32_0 = arith.constant 0 : i32
    %c0_i32_1 = arith.constant 0 : i32
    return %c0_i32, %c0_i32_0 : i32, i32
  }
  func.func @transform_3(%arg0: i32) -> (i32, i32) {
    %c0_i32 = arith.constant 0 : i32
    %c0_i32_0 = arith.constant 0 : i32
    return %arg0, %c0_i32 : i32, i32
  }
}

</mosaic_0001>

<bundles_post_ra>
// kernel: tpu_custom_call.1
= control target key start
LH: loop header
LB: loop body
LE: loop exit
PB: predicated region body
PF: predicated region fallthrough
CT: control target
= control target key end

     0   :  { %vm56_vm0 = vcmask 1041408   ;;  %vm49_vm1 = vcmask 162816   ;;  %s231_s0 = inlined_call_operand.vmem [shape: bf16[32,20], index: 0, kind: input, shape index: {}]   ;;  %s232_s1 = inlined_call_operand.vmem [shape: bf16[20,32], index: 1, kind: input, shape index: {}]   ;;  %s233_s2 = inlined_call_operand.vmem [shape: f32[1,32], index: 2, kind: input, shape index: {}]   ;;  %s234_s3 = inlined_call_operand.hbm [shape: f32[32,32], index: 3, kind: output, shape index: {}]  }
   0x1   :  { %v153_v0 = vld [vmem:[%s232_s1] sm:$0xff]   ;;  %v154_v1 = vld [vmem:[%s232_s1 + $0x8] ss:$0 sps:$4 sm:$0x33]  }
   0x2   :  { %v155_v2 = vld [vmem:[%s231_s0] sm:$0xff]   ;;  %141 = vmatprep.subr.bf16.mxu0 %v153_v0  ;;  %v58_v3 = vsel %vm56_vm0, %v154_v1, 0 }
   0x3   :  { %142 = vmatpush3.bf16.msra.mxu0 %v153_v0  ;;  %145 = vmatprep.mubr.msk.bf16.mxu0 %vm49_vm1, %v155_v2 }
   0x4   :  { %149 = vmatprep.subr.msk.bf16.mxu0 %vm56_vm0, %v154_v1 }
   0x5   :  { %8 = vsyncpa [#allocation3], 0  ;;  %v156_v4 = vld [vmem:[%s231_s0 + $0x8] sm:$0xff]   ;;  %v130_v5 = vld [vmem:[%s233_s2] ss:$0 sm:$0xff]  ;;  %vm109_vm2 = vcmask 261120  }
   0x6   :  { %s181_s1 = smov [#allocation2]  }
   0x7   :  { %144 = vmatpush3.bf16.msra.mxu0 %v58_v3  ;;  %s119_s22 = sshll.u32 %s181_s1, 4  ;;  %s120_s22 = int_to_ptr.vmem [resolvable:$true] %s119_s22 }
   0x8   :  { %s157_s0 = scalar_lea.vmem %s120_s22, 512  ;;  %p162_p1 = scmp.lt.s32.totalorder %s120_s22, %s120_s22 }
   0x9   :  { %p158_p0 = scmp.ne.s32.totalorder %s120_s22, %s157_s0  ;;  %p163_p2 = scmp.lt.s32.totalorder %s157_s0, %s157_s0 }
   0xa   :  { %146 = vmatmul.mubr.msk.bf16.vlgmr.msra.gmra.mrb[0].mxu0 %vm49_vm1, %v156_v4 }
   0xb   :  { %p164_p3 = por %p163_p2, %p162_p1 }
   0xd   :  { %p165_p4 = pnand %p164_p3, %p158_p0 }
  0xdd   :  { %v147_v6 = vpop.f32.mrb[0].mxu0 }
  0xde   :  { %v103_v7 = vadd.f32 %v147_v6, %v130_v5  ;;  %v94_v8 = vpop.f32.mrb[1].mxu0 }
  0xdf   :  { %v95_v9 = vadd.f32 %v130_v5, %v94_v8  ;;  %v148_v10 = vpop.f32.mrb[2].mxu0 }
  0xe0   :  { %112 = vst.msk [vmem:[#allocation2 + $0x10] sm:$0xff] %vm109_vm2, %v103_v7  ;;  %v106_v11 = vadd.f32 %v148_v10, %v130_v5  ;;  %v97_v12 = vpop.f32.mrb[3].mxu0 }
  0xe1   :  { %110 = vst.msk [vmem:[#allocation2] sm:$0xff] %vm109_vm2, %v95_v9  ;;  %v98_v13 = vadd.f32 %v130_v5, %v97_v12 }
  0xe2   :  { %113 = vst.msk [vmem:[#allocation2 + $0x18] sm:$0xff] %vm109_vm2, %v106_v11 }
  0xe3   :  { %111 = vst.msk [vmem:[#allocation2 + $0x8] sm:$0xff] %vm109_vm2, %v98_v13 }
  0xe4   :  { %168 = shalt.err (!%p165_p4)
}
  0xe5   :  { %s169_s24 = scalar_lea.hbm %s234_s3, 512 }
  0xe6   :  { %p170_p5 = scmp.ne.s32.totalorder %s234_s3, %s169_s24  ;;  %p173_p6 = scmp.lt.u32.totalorder %s169_s24, %s234_s3 }
  0xe8   :  { %p175_p7 = pnand %p173_p6, %p170_p5 }
  0xea   :  { %178 = shalt.err (!%p175_p7)
}
  0xeb   :  { %s182_s29 = smov 128   ;;  %s183_s30 = smov 8  }
  0xec   :  { %125 = dma.vmem_to_hbm [thread:$0]  %s120_s22, 512, %s234_s3, [#allocation3], %s182_s29, %s182_s29, %s183_s30  }
  0xed   :  { %179 = dma.done.wait [#allocation3], 512  }
  0xee   :  { %180 = vsyncadd [#allocation3], 4294966784 }
  0xef   :  { %129 = vsyncpa [#allocation3], 1 }

</bundles_post_ra>
